<compile_context>
chip_gen: v7x
topology: tpu7x:2x2x1
jax: 0.10.0
libtpu: 0.0.40
codegen_flags: <defaults>
</compile_context>

<pallas_src>
import functools

import jax
import jax.numpy as jnp
from jax.experimental import pallas as pl
from jax.experimental.pallas import tpu as pltpu


# Fallback tiles for the padded (irregular large shape) path.
_FALLBACK_TM, _FALLBACK_TN, _FALLBACK_TK = 256, 256, 512


def _round_up(v, m):
    return ((v + m - 1) // m) * m


@functools.lru_cache(maxsize=None)
def _tpu_config():
    """Generation-dependent tiling.

    Large tiles on 128-MiB-VMEM chips (v5e/v6e); capped tiles + lower scoped-VMEM
    limit on 64-MiB v7x.  Falls back to the v7x-safe config if the hardware query
    is unavailable (safe on every generation, just not maximal on v6e)."""
    vmem_bytes = 64 * 1024 * 1024
    try:
        info = pltpu.get_tpu_info()
        vmem_bytes = int(getattr(info, "vmem_capacity_bytes", vmem_bytes))
    except Exception:
        pass
    if vmem_bytes >= 96 * 1024 * 1024:
        # v5e / v6e: 1024-wide output tiles -> ~256 FLOP/byte, firmly compute-bound;
        # double-buffered f32 footprint ~40 MiB fits well inside a 64 MiB limit.
        return dict(tm=1024, tn=1024, tk=2048,
                    vmem_limit=64 * 1024 * 1024,
                    single_block_bytes=24 * 1024 * 1024)
    # v7x: 64 MiB physical VMEM, 2 TensorCores -> cap tiles (~18 MiB double-buffered).
    return dict(tm=512, tn=512, tk=2048,
                vmem_limit=48 * 1024 * 1024,
                single_block_bytes=16 * 1024 * 1024)


def _cost(M, K, N, tm, tn, x_dtype, w_dtype):
    # x panel is streamed once per output-column block, w once per output-row block.
    n_col_passes = -(-N // tn)
    n_row_passes = -(-M // tm)
    bytes_accessed = (jnp.dtype(x_dtype).itemsize * M * K * n_col_passes
                      + jnp.dtype(w_dtype).itemsize * K * N * n_row_passes
                      + 4 * M * N)
    return pl.CostEstimate(flops=2 * M * K * N, transcendentals=0,
                           bytes_accessed=int(bytes_accessed))


# ---------------------------------------------------------------------------
# Kernels
# ---------------------------------------------------------------------------
def _single_block_kernel(x_ref, w_ref, o_ref):
    # Whole (small) operands live in VMEM; one MXU matmul.
    o_ref[...] = jnp.dot(
        x_ref[...], w_ref[...], preferred_element_type=jnp.float32
    ).astype(o_ref.dtype)


def _tiled_matmul_kernel(x_ref, w_ref, o_ref):
    # The output BlockSpec index is constant along k, so the f32 output tile is
    # VMEM-resident across the whole reduction: accumulate directly into it
    # (no separate scratch accumulator, no final copy).
    @pl.when(pl.program_id(2) == 0)
    def _():
        o_ref[...] = jnp.zeros_like(o_ref)

    o_ref[...] += jnp.dot(
        x_ref[...], w_ref[...], preferred_element_type=jnp.float32
    )


# ---------------------------------------------------------------------------
# pallas_call wrappers
# ---------------------------------------------------------------------------
def _single_block_call(x, w0, vmem_limit):
    M, K = x.shape
    _, N = w0.shape
    return pl.pallas_call(
        _single_block_kernel,
        out_shape=jax.ShapeDtypeStruct((M, N), jnp.float32),
        in_specs=[
            pl.BlockSpec((M, K), lambda: (0, 0)),
            pl.BlockSpec((K, N), lambda: (0, 0)),
        ],
        out_specs=pl.BlockSpec((M, N), lambda: (0, 0)),
        compiler_params=pltpu.CompilerParams(vmem_limit_bytes=vmem_limit),
        cost_estimate=_cost(M, K, N, M, N, x.dtype, w0.dtype),
    )(x, w0)


def _tiled_call(x, w0, tm, tn, tk, vmem_limit):
    M, K = x.shape
    _, N = w0.shape
    grid = (M // tm, N // tn, K // tk)
    return pl.pallas_call(
        _tiled_matmul_kernel,
        out_shape=jax.ShapeDtypeStruct((M, N), jnp.float32),
        grid_spec=pltpu.PrefetchScalarGridSpec(
            num_scalar_prefetch=0,
            grid=grid,
            in_specs=[
                pl.BlockSpec((tm, tk), lambda i, j, k: (i, k)),
                pl.BlockSpec((tk, tn), lambda i, j, k: (k, j)),
            ],
            out_specs=pl.BlockSpec((tm, tn), lambda i, j, k: (i, j)),
        ),
        compiler_params=pltpu.CompilerParams(
            dimension_semantics=("parallel", "parallel", "arbitrary"),
            vmem_limit_bytes=vmem_limit,
        ),
        cost_estimate=_cost(M, K, N, tm, tn, x.dtype, w0.dtype),
    )(x, w0)


def _fit_tiles(M, N, K, tm, tn, tk):
    """Shrink tiles to the problem (full-dim blocks are always legal) and keep at
    least 2 parallel (i, j) grid points when cheaply possible, so v7x's two
    TensorCores both get work on the 'parallel' grid axes."""
    tm, tn, tk = min(tm, M), min(tn, N), min(tk, K)
    if M % tm == 0 and N % tn == 0 and (M // tm) * (N // tn) < 2:
        if tn >= 256 and tn % 256 == 0:
            tn //= 2
        elif tm >= 256 and tm % 256 == 0:
            tm //= 2
    return tm, tn, tk


def _padded_tiled_call(x, w0, vmem_limit):
    """Large irregular shapes: pad only the misaligned dims (zero padding along the
    contraction axis is exact), run a modest-tile grid, slice only if needed."""
    M, K = x.shape
    _, N = w0.shape
    tm = min(_FALLBACK_TM, _round_up(M, 8))
    tk = min(_FALLBACK_TK, _round_up(K, 128))
    tn = min(_FALLBACK_TN, _round_up(N, 128))
    Mp, Kp, Np = _round_up(M, tm), _round_up(K, tk), _round_up(N, tn)
    x_p = x if (Mp == M and Kp == K) else jnp.pad(x, ((0, Mp - M), (0, Kp - K)))
    w_p = w0 if (Kp == K and Np == N) else jnp.pad(w0, ((0, Kp - K), (0, Np - N)))
    out = _tiled_call(x_p, w_p, tm, tn, tk, vmem_limit)
    return out if (Mp == M and Np == N) else out[:M, :N]


@jax.jit
def dense_binary_pca_forward(x, w0):
    """act = x @ w0, computed in a Pallas TPU kernel.

    x  : [M, D1]
    w0 : [D1, D2]  (this is W_list[0][0] from the torch module)
    returns [M, D2] float32
    """
    M, K = x.shape
    Kw, N = w0.shape
    assert K == Kw
    cfg = _tpu_config()

    # Don't force-upcast: bf16 inputs feed the MXU at bf16 rate and halve HBM bytes.
    # Anything else goes to f32.  Accumulation and output are always f32, matching
    # torch.mm on the module's f32 parameters.
    def _mxu_dtype(a):
        return a if a.dtype in (jnp.float32, jnp.bfloat16) else a.astype(jnp.float32)

    x = _mxu_dtype(x)
    w0 = _mxu_dtype(w0)

    tm, tn, tk = _fit_tiles(M, N, K, cfg["tm"], cfg["tn"], cfg["tk"])
    divisible = (M % tm == 0) and (N % tn == 0) and (K % tk == 0)
    grid_size = (M // tm) * (N // tn) * (K // tk) if divisible else 0
    total_bytes = (x.dtype.itemsize * M * K
                   + w0.dtype.itemsize * K * N
                   + 4 * M * N)

    if divisible and grid_size > 1:
        # Tiled, pipelined path: DMA overlaps MXU compute, no padding, no slicing.
        return _tiled_call(x, w0, tm, tn, tk, cfg["vmem_limit"])
    if (divisible and grid_size == 1) or total_bytes <= cfg["single_block_bytes"]:
        # Small / irregular shapes that fit VMEM (incl. the module defaults
        # M=8, D1=3, D2=2): full-shape blocks, no padding, no output slicing.
        return _single_block_call(x, w0, cfg["vmem_limit"])
    # Large, irregular shapes: minimal per-dim padding + tiled grid + slice.
    return _padded_tiled_call(x, w0, cfg["vmem_limit"])


# ---------------------------------------------------------------------------
# Parameter construction (mirrors the torch module __init__)
# ---------------------------------------------------------------------------
def init_params(key, N=5, D1=3, D2=2, bitwidth=2):
    """W_list[i] ~ Normal(0,1) of shape (N, D1, D2); Delta_list[i] of shape (D1*D2,).
    Only W_list[0][0] is used by forward()."""
    params = {"W_list": [], "Delta_list": []}
    D = D1 * D2
    for _ in range(bitwidth):
        key, k_w, k_d = jax.random.split(key, 3)
        params["W_list"].append(jax.random.normal(k_w, (N, D1, D2), jnp.float32))
        params["Delta_list"].append(jax.random.normal(k_d, (D,), jnp.float32))
    params["TWO"] = jnp.float32(2.0)
    return params


if __name__ == "__main__":
    key = jax.random.PRNGKey(0)

    # ---- Case 1: module-default sizes (single full-block path, no padding).
    N_, D1, D2, bitwidth = 5, 3, 2, 2
    key, k_params, k_x = jax.random.split(key, 3)
    params = init_params(k_params, N=N_, D1=D1, D2=D2, bitwidth=bitwidth)
    batch = 8
    x_small = jax.random.normal(k_x, (batch, D1), jnp.float32)
    w_small = params["W_list"][0][0]  # (D1, D2)

    act_small = jax.block_until_ready(dense_binary_pca_forward(x_small, w_small))
    ref_small = x_small @ w_small
    assert act_small.shape == (batch, D2)
    assert jnp.allclose(act_small, ref_small, atol=1e-5, rtol=1e-5)

    # ---- Case 2: tile-aligned sizes exercising the tiled (M, N, K) grid path.
    Ml, Kl, Nl = 512, 2048, 512
    key, k_xl, k_wl = jax.random.split(key, 3)
    x_large = jax.random.normal(k_xl, (Ml, Kl), jnp.float32)
    w_large = jax.random.normal(k_wl, (Kl, Nl), jnp.float32)

    act_large = jax.block_until_ready(dense_binary_pca_forward(x_large, w_large))
    ref_large = x_large @ w_large
    assert act_large.shape == (Ml, Nl)
    assert jnp.allclose(act_large, ref_large, atol=1e-3, rtol=1e-3)

    # ---- Case 3: large irregular shape exercising the minimal-padding fallback.
    Mi, Ki, Ni = 1030, 3100, 1030
    key, k_xi, k_wi = jax.random.split(key, 3)
    x_irr = jax.random.normal(k_xi, (Mi, Ki), jnp.float32)
    w_irr = jax.random.normal(k_wi, (Ki, Ni), jnp.float32)

    act_irr = jax.block_until_ready(dense_binary_pca_forward(x_irr, w_irr))
    ref_irr = x_irr @ w_irr
    assert act_irr.shape == (Mi, Ni)
    assert jnp.allclose(act_irr, ref_irr, atol=1e-2, rtol=1e-2)

    print("KERNEL_OK")
</pallas_src>

<mosaic_0001>
module attributes {stable_mosaic.version = 11 : i64} {
  func.func @_single_block_kernel(%arg0: memref<8x3xf32, #tpu.memory_space<vmem>>, %arg1: memref<3x2xf32, #tpu.memory_space<vmem>>, %arg2: memref<8x2xf32, #tpu.memory_space<vmem>>) attributes {dimension_semantics = [], scalar_prefetch = 0 : i64, scratch_operands = 0 : i64, tpu.core_type = #tpu.core_type<tc>} {
    %c0 = arith.constant 0 : index
    %c0_0 = arith.constant 0 : index
    %0 = vector.load %arg0[%c0, %c0_0] : memref<8x3xf32, #tpu.memory_space<vmem>>, vector<8x3xf32>
    %c0_1 = arith.constant 0 : index
    %c0_2 = arith.constant 0 : index
    %1 = vector.load %arg1[%c0_1, %c0_2] : memref<3x2xf32, #tpu.memory_space<vmem>>, vector<3x2xf32>
    %cst = arith.constant dense<0.000000e+00> : vector<8x2xf32>
    %2 = tpu.matmul %0, %1, %cst {dimension_numbers = #tpu.dot_dimension_numbers<[1], [0], [0], [1], [0, 0, 1, 1], [], []>} : vector<8x3xf32>, vector<3x2xf32>, vector<8x2xf32> -> vector<8x2xf32>
    %c0_3 = arith.constant 0 : index
    %c0_4 = arith.constant 0 : index
    %3 = vector.load %arg2[%c0_3, %c0_4] : memref<8x2xf32, #tpu.memory_space<vmem>>, vector<8x2xf32>
    tpu.vector_store %arg2[%c0_3, %c0_4], %2 {strides = array<i32>} : memref<8x2xf32, #tpu.memory_space<vmem>>, vector<8x2xf32>,
    return
  }
}

</mosaic_0001>

<bundles_post_ra>
// kernel: dense_binary_pca_forward.1
= control target key start
LH: loop header
LB: loop body
LE: loop exit
PB: predicated region body
PF: predicated region fallthrough
CT: control target
= control target key end

     0   :  { %vm17_vm0 = vcmask 1042432   ;;  %vm13_vm1 = vcmask 23552   ;;  %v108_v0 = vmov 0.0   ;;  %vm109_vm2 = vmmov 0   ;;  %s134_s1 = inlined_call_operand.vmem [shape: f32[3,2], index: 1, kind: input, shape index: {}]   ;;  %s135_s0 = inlined_call_operand.vmem [shape: f32[8,3], index: 0, kind: input, shape index: {}]   ;;  %s136_s2 = inlined_call_operand.vmem [shape: f32[8,2], index: 2, kind: output, shape index: {}]  }
   0x1   :  { %101 = vmatprep.subr.mxu0 %v108_v0  ;;  %v12_v1 = vld [vmem:[%s134_s1] sm:$0x7]  ;;  %103 = vmatprep.mubr.msk.f32.mxu0 %vm109_vm2, %v108_v0  ;;  %vm91_vm3 = vcmask 15360  }
   0x2   :  { %v11_v2 = vld [vmem:[%s135_s0] sm:$0xff]  ;;  %102 = vmatpush3.msk.msra.mxu0 %vm17_vm0, %v12_v1 }
   0x3   :  { %104 = vmatmul.mubr.msk.f32.vlgmr.msra.gmra.mrb[0].mxu0 %vm13_vm1, %v11_v2 }
  0xd6   :  { %v87_v3 = vpop.f32.mrb[0].mxu0 }
  0xd7   :  { %92 = vst.msk [vmem:[%s136_s2] sm:$0xff] %vm91_vm3, %v87_v3  ;;  %v105_v4 = vpop.f32.mrb[1].mxu0 }

</bundles_post_ra>
